<compile_context>
chip_gen: v5e
topology: v5e:2x2
jax: 0.10.0
libtpu: 0.0.40
codegen_flags: <defaults>
</compile_context>

<pallas_src>
import functools

import jax
import jax.numpy as jnp
from jax import lax
from jax.experimental import pallas as pl
from jax.experimental.pallas import tpu as pltpu


# ---------------------------------------------------------------------------
# Path 1: small-vocab fast path — VMEM-resident table, MXU one-hot gather.
# ---------------------------------------------------------------------------
def _vmem_onehot_gather_kernel(ids_ref, table_ref, out_ref):
    """Gather one token block from a VMEM-resident table.

    ids_ref   : VMEM int32[TM, 1]     (this block's clamped token ids)
    table_ref : VMEM f32[V, E_pad]    (resident: constant index_map, DMA'd once)
    out_ref   : VMEM f32[TM, E_pad]
    """
    ids = ids_ref[...]                                    # (TM, 1)
    tm = ids.shape[0]
    v = table_ref.shape[0]
    iota = lax.broadcasted_iota(jnp.int32, (tm, v), 1)    # (TM, V)
    onehot = (ids == iota).astype(table_ref.dtype)        # exactly 0.0 / 1.0
    # HIGHEST precision keeps the f32 gather exact to ~1 ulp (bf16 is exact).
    gathered = jnp.dot(onehot, table_ref[...],
                       preferred_element_type=jnp.float32,
                       precision=lax.Precision.HIGHEST)
    out_ref[...] = gathered.astype(out_ref.dtype)


# ---------------------------------------------------------------------------
# Path 2: general path — table in HBM, deep pipeline of per-row DMAs.
# ---------------------------------------------------------------------------
def _hbm_row_gather_kernel(ids_ref, table_hbm, out_ref, sems, *, depth):
    """Gather TM embedding rows from HBM into this block's output tile.

    ids_ref   : SMEM int32[N_pad]     (scalar prefetch: all clamped token ids)
    table_hbm : HBM  f32[V, E_pad]    (never staged wholesale in VMEM)
    out_ref   : VMEM f32[TM, E_pad]   (lane-dense output block)
    sems      : DMA semaphores, shape (depth,)  — one per in-flight slot
    """
    tm = out_ref.shape[0]
    base = pl.program_id(0) * tm

    def _dma(t, row):
        # One embedding row: HBM table[row] -> VMEM out[t]; slot = t % depth.
        return pltpu.make_async_copy(table_hbm.at[row], out_ref.at[t],
                                     sems.at[t % depth])

    # Prime: put `depth` row copies in flight (static trip count -> unrolled).
    def _prime(t, c):
        _dma(t, ids_ref[base + t]).start()
        return c
    lax.fori_loop(0, depth, _prime, 0, unroll=True)

    # Steady state: retire the copy occupying this slot, reuse it immediately.
    def _steady(t, c):
        # Hoist SMEM id reads ABOVE the wait: a DMA .wait() breaks SMEM
        # store->load forwarding and would stall the scalar slot per row.
        row_new = ids_ref[base + t]
        row_old = ids_ref[base + t - depth]
        _dma(t - depth, row_old).wait()     # matching descriptor, own slot sem
        _dma(t, row_new).start()
        return c
    lax.fori_loop(depth, tm, _steady, 0, unroll=4)

    # Drain: the last `depth` copies must land before the block is written back.
    def _drain(t, c):
        row = ids_ref[base + t]
        _dma(t, row).wait()
        return c
    lax.fori_loop(tm - depth, tm, _drain, 0, unroll=True)


# ---------------------------------------------------------------------------
# Wrapper
# ---------------------------------------------------------------------------
def uncontextualized_embedding(
        ids,
        table,
        *,
        block_tokens=None,            # None -> auto-size (~2 MiB output block)
        max_inflight_rows=32,         # guidance: 16 on v5e, 32 on v6e, 64 on v7x
        target_block_bytes=2 * 1024 * 1024,
        fast_path_max_vocab=1024,
        fast_path_max_table_bytes=4 * 1024 * 1024,
        force_hbm_gather=False):
    """ids: int [B, W]; table: float [V, E] -> (embs [B, W, E], mask [B, W] int32)."""
    B, W = ids.shape
    V, E = table.shape
    n_tok = B * W

    # mask = x > 0: trivial elementwise op, left to the wrapper (XLA fuses it).
    mask = (ids > 0).astype(jnp.int32)

    itemsize = jnp.dtype(table.dtype).itemsize
    # dtype-aware sublane alignment for the (TM, E_pad) output block.
    sub = max(8, 32 // itemsize)          # 8 f32 / 16 bf16 / 32 int8-fp8
    e_pad = ((E + 127) // 128) * 128      # lane-dense output (unmasked vst)
    table_p = table if e_pad == E else jnp.pad(table, ((0, 0), (0, e_pad - E)))

    # --- pick the token block size -----------------------------------------
    if block_tokens is None:
        row_bytes = e_pad * itemsize
        tm = max(sub, (target_block_bytes // row_bytes) // sub * sub)
    else:
        tm = int(block_tokens)
        if tm % sub != 0:
            raise ValueError(
                f"block_tokens must be a multiple of {sub} for dtype {table.dtype}")
    n_tok_aligned = ((n_tok + sub - 1) // sub) * sub
    tm = min(tm, n_tok_aligned)
    # Note for v7x: keep n_blocks >= 2 so the "parallel" axis load-balances
    # across both TensorCores (automatic here unless the input itself is tiny).
    n_blocks = (n_tok + tm - 1) // tm
    n_pad = n_blocks * tm

    ids_flat = ids.reshape(-1).astype(jnp.int32)
    if n_pad != n_tok:
        # TODO(synk): handle the ragged tail with a masked last block instead of
        # padded dummy gathers + the post-kernel slice copy below.
        ids_flat = jnp.pad(ids_flat, (0, n_pad - n_tok))
    # Clamp so gathers are always in-bounds (jnp.take semantics; torch raises).
    ids_flat = jnp.clip(ids_flat, 0, V - 1)

    table_bytes = V * e_pad * itemsize
    use_fast = (not force_hbm_gather
                and V <= fast_path_max_vocab
                and table_bytes <= fast_path_max_table_bytes)

    # --- VMEM budget / compiler params --------------------------------------
    out_block_bytes = tm * e_pad * itemsize
    if use_fast:
        ids_block_bytes = tm * 128 * 4        # (TM,1) int32 block lane-pads to 128
        vmem_need = 2 * out_block_bytes + 2 * ids_block_bytes + table_bytes
    else:
        vmem_need = 2 * out_block_bytes
    vmem_need += 1 << 20
    cp_kwargs = dict(dimension_semantics=("parallel",))
    if vmem_need > (16 << 20):                # v5e's default scoped-VMEM limit
        cp_kwargs["vmem_limit_bytes"] = int(min(vmem_need + (4 << 20), 48 << 20))
    compiler_params = pltpu.CompilerParams(**cp_kwargs)

    if use_fast:
        # --- Path 1: VMEM-resident table, MXU one-hot gather ----------------
        ids_2d = ids_flat.reshape(n_pad, 1)
        grid_spec = pltpu.PrefetchScalarGridSpec(
            num_scalar_prefetch=0,
            grid=(n_blocks,),
            in_specs=[
                pl.BlockSpec((tm, 1), lambda b: (b, 0)),          # ids (VMEM)
                pl.BlockSpec((V, e_pad), lambda b: (0, 0)),       # resident table
            ],
            out_specs=pl.BlockSpec((tm, e_pad), lambda b: (b, 0)),
        )
        cost = pl.CostEstimate(
            flops=2 * n_pad * V * e_pad, transcendentals=0,
            bytes_accessed=int(table_bytes + 2 * n_pad * e_pad * itemsize
                               + 4 * n_pad))
        gathered = pl.pallas_call(
            _vmem_onehot_gather_kernel,
            out_shape=jax.ShapeDtypeStruct((n_pad, e_pad), table_p.dtype),
            grid_spec=grid_spec,
            compiler_params=compiler_params,
            cost_estimate=cost,
        )(ids_2d, table_p)
    else:
        # --- Path 2: HBM table, deep per-row DMA pipeline --------------------
        depth = min(int(max_inflight_rows), tm)
        depth = max(4, depth - depth % 4)     # keep steady trip count unroll-friendly
        grid_spec = pltpu.PrefetchScalarGridSpec(
            num_scalar_prefetch=1,
            grid=(n_blocks,),
            in_specs=[pl.BlockSpec(memory_space=pl.ANY)],         # table in HBM
            out_specs=pl.BlockSpec((tm, e_pad), lambda b, ids: (b, 0)),
            scratch_shapes=[pltpu.SemaphoreType.DMA((depth,))],
        )
        cost = pl.CostEstimate(
            flops=0, transcendentals=0,
            bytes_accessed=int(2 * n_pad * e_pad * itemsize + 4 * n_pad))
        gathered = pl.pallas_call(
            functools.partial(_hbm_row_gather_kernel, depth=depth),
            out_shape=jax.ShapeDtypeStruct((n_pad, e_pad), table_p.dtype),
            grid_spec=grid_spec,
            compiler_params=compiler_params,
            cost_estimate=cost,
        )(ids_flat, table_p)

    # Un-pad only when padding was actually introduced (avoids a full-output
    # slice copy in the common aligned case); reshape is metadata-only.
    if n_pad != n_tok or e_pad != E:
        gathered = gathered[:n_tok, :E]
    embs = gathered.reshape(B, W, E)
    return embs, mask


if __name__ == "__main__":
    B, W = 2, 8          # batch, words per sentence
    V, E = 64, 128       # vocab size, embedding dim (one full 128-lane tile)

    key = jax.random.PRNGKey(0)
    k_ids, k_tbl = jax.random.split(key)

    table = jax.random.normal(k_tbl, (V, E), dtype=jnp.float32)
    ids = jax.random.randint(k_ids, (B, W), 0, V, dtype=jnp.int32)
    ids = ids.at[0, -2:].set(0)   # force some padding so the mask is non-trivial

    ref_embs = jnp.take(table, ids, axis=0)
    ref_mask = (ids > 0).astype(jnp.int32)

    # Path 1: small-vocab fast path (table resident in VMEM, MXU gather).
    # Small block_tokens so the demo exercises a multi-block parallel grid.
    embs_fast, mask_fast = uncontextualized_embedding(ids, table, block_tokens=8)
    embs_fast = jax.block_until_ready(embs_fast)
    mask_fast = jax.block_until_ready(mask_fast)
    assert embs_fast.shape == (B, W, E) and mask_fast.shape == (B, W)
    assert jnp.allclose(embs_fast, ref_embs, rtol=0.0, atol=1e-5), \
        "fast-path embedding gather mismatch"
    assert jnp.array_equal(mask_fast, ref_mask), "fast-path mask mismatch"

    # Path 2: general HBM row-DMA gather path (forced; small depth so the
    # prime / steady / drain stages of the DMA pipeline all execute).
    embs_dma, mask_dma = uncontextualized_embedding(
        ids, table, block_tokens=8, max_inflight_rows=4, force_hbm_gather=True)
    embs_dma = jax.block_until_ready(embs_dma)
    mask_dma = jax.block_until_ready(mask_dma)
    assert jnp.array_equal(embs_dma, ref_embs), "HBM-gather embedding mismatch"
    assert jnp.array_equal(mask_dma, ref_mask), "HBM-gather mask mismatch"

    print("KERNEL_OK")
</pallas_src>

<mosaic_0001>
module attributes {stable_mosaic.version = 11 : i64} {
  func.func @_vmem_onehot_gather_kernel(%arg0: i32, %arg1: memref<8x1xi32, #tpu.memory_space<vmem>>, %arg2: memref<64x128xf32, #tpu.memory_space<vmem>>, %arg3: memref<8x128xf32, #tpu.memory_space<vmem>>) attributes {dimension_semantics = [#tpu.dimension_semantics<parallel>], iteration_bounds = array<i64: 2>, scalar_prefetch = 0 : i64, scratch_operands = 0 : i64, tpu.core_type = #tpu.core_type<tc>, window_params = [{transform_indices = @transform_0, window_bounds = array<i64: 8, 1>}, {pipeline_mode = #tpu.pipeline_mode<synchronous>, transform_indices = @transform_1, window_bounds = array<i64: 64, 128>}, {transform_indices = @transform_2, window_bounds = array<i64: 8, 128>}]} {
    %c0 = arith.constant 0 : index
    %c0_0 = arith.constant 0 : index
    %0 = vector.load %arg1[%c0, %c0_0] : memref<8x1xi32, #tpu.memory_space<vmem>>, vector<8x1xi32>
    %1 = tpu.iota {dimensions = array<i32: 1>} : vector<8x64xi32>
    %2 = vector.broadcast %0 : vector<8x1xi32> to vector<8x64xi32>
    %3 = arith.cmpi eq, %2, %1 : vector<8x64xi32>
    %4 = arith.extui %3 : vector<8x64xi1> to vector<8x64xi32>
    %5 = arith.sitofp %4 : vector<8x64xi32> to vector<8x64xf32>
    %c0_1 = arith.constant 0 : index
    %c0_2 = arith.constant 0 : index
    %6 = vector.load %arg2[%c0_1, %c0_2] : memref<64x128xf32, #tpu.memory_space<vmem>>, vector<64x128xf32>
    %cst = arith.constant dense<0.000000e+00> : vector<8x128xf32>
    %7 = tpu.matmul %5, %6, %cst {dimension_numbers = #tpu.dot_dimension_numbers<[1], [0], [0], [1], [0, 0, 1, 1], [], []>, precision = #tpu.contract_precision<fp32>} : vector<8x64xf32>, vector<64x128xf32>, vector<8x128xf32> -> vector<8x128xf32>
    %c0_3 = arith.constant 0 : index
    %c0_4 = arith.constant 0 : index
    %8 = vector.load %arg3[%c0_3, %c0_4] : memref<8x128xf32, #tpu.memory_space<vmem>>, vector<8x128xf32>
    tpu.vector_store %arg3[%c0_3, %c0_4], %7 {strides = array<i32>} : memref<8x128xf32, #tpu.memory_space<vmem>>, vector<8x128xf32>,
    return
  }
  func.func @transform_0(%arg0: i32) -> (i32, i32) {
    %c0_i32 = arith.constant 0 : i32
    %c0_i32_0 = arith.constant 0 : i32
    return %arg0, %c0_i32 : i32, i32
  }
  func.func @transform_1(%arg0: i32) -> (i32, i32) {
    %c0_i32 = arith.constant 0 : i32
    %c0_i32_0 = arith.constant 0 : i32
    %c0_i32_1 = arith.constant 0 : i32
    return %c0_i32, %c0_i32_0 : i32, i32
  }
  func.func @transform_2(%arg0: i32) -> (i32, i32) {
    %c0_i32 = arith.constant 0 : i32
    %c0_i32_0 = arith.constant 0 : i32
    return %arg0, %c0_i32 : i32, i32
  }
}

</mosaic_0001>

<bundles_post_ra>
// kernel: tpu_custom_call.1
= control target key start
LH: loop header
LB: loop body
LE: loop exit
PB: predicated region body
PF: predicated region fallthrough
CT: control target
= control target key end

     0   :  { %7 = vsyncpa [#allocation3], 0  ;;  %s859_s0 = inlined_call_operand.vmem [shape: s32[16,1], index: 0, kind: input, shape index: {}]   ;;  %s860_s1 = inlined_call_operand.hbm [shape: f32[64,128], index: 1, kind: input, shape index: {}]   ;;  %s861_s2 = inlined_call_operand.hbm [shape: f32[16,128], index: 2, kind: output, shape index: {}]  }
   0x1   :  { %8 = vsyncpa [#allocation4], 0 }
   0x2   :  { %10 = vsyncpa [#allocation4 + $0x1], 0  ;;  %s691_s9 = smov 0   ;;  %s693_s10 = smov 0  }
   0x3   :  { %s695_s11 = smov 0   ;;  %s697_s12 = smov 0  }
   0x4 LB: > { %s712_s13 = sadd.s32 4294967295, %s669_s12   ;;  %s502_s14 = sadd.s32 4294967294, %s669_s12   ;;  %s669_s12 = sphi %s697_s12, %s867_s12   ;;  %s665_s11 = sphi %s695_s11, %s866_s11   ;;  %s661_s10 = sphi %s693_s10, %s865_s10   ;;  %s657_s9 = sphi %s691_s9, %s864_s9  }
   0x5   : > { %s716_s15 = sadd.s32 1, %s669_s12   ;;  %s70_s16 = sadd.s32 1, %s665_s11 }
   0x6   : > { %s67_s17 = ssub.s32 %s669_s12, %s716_s15  ;;  %p80_p0 = scmp.ne.s32.totalorder %s665_s11, %s661_s10 }
   0x7   : > { %p68_p1 = scmp.eq.s32.totalorder %s67_s17, 0  ;;  %p81_p2 = scmp.eq.s32.totalorder %s712_s13, 1 }
   0x8   : > { %p86_p3 = scmp.ne.s32.totalorder %s661_s10, %s657_s9  ;;  %p87_p4 = scmp.eq.s32.totalorder %s502_s14, 1 }
   0x9   : > { %s727_s18 = scalar_select %p68_p1, %s665_s11, %s70_s16  }
   0xa   : > { %p729_p5 = por %p81_p2, %p80_p0  ;;  %p733_p6 = por %p87_p4, %p86_p3 }
   0xb   : > { %p503_p7 = scmp.ge.s32.totalorder %s669_s12, 1  ;;  %p94_p8 = scmp.lt.s32.totalorder %s669_s12, 3 }
   0xc   : > { %p532_p9 = scmp.eq.s32.totalorder %s712_s13, 0  ;;  %s105_s23 = sshll.u32 %s860_s1, 4  ;;  %s106_s23 = int_to_ptr.hbm [resolvable:$true] %s105_s23 }
   0xd   : > { %p95_p10 = pnand %p503_p7, %p94_p8  ;;  %s671_s24 = smov [#allocation2]  }
   0xe   : > { %s107_s25 = sshll.u32 %s671_s24, 4  ;;  %s672_s26 = smov 128   ;;  %s108_s25 = int_to_ptr.vmem [resolvable:$true] %s107_s25 }
   0xf   : > { %p524_p11 = pneg %p95_p10  ;;  %s673_s27 = smov 8  }
  0x10   : > { %130 = sbr.rel (%p95_p10) target bundleno = 296 (0x128), region = 28 }
  0x11   : > { %p525_p12 = pnand %p532_p9, %p524_p11 }
  0x13   : > { %527 = dma.hbm_to_vmem [thread:$0]  (!%p525_p12), %s106_s23, 1024, %s108_s25, [#allocation3], %s672_s26, %s672_s26, %s673_s27  }
  0x15   : > { %648 = dma.done.wait (%p532_p9), [#allocation3], 1024  }
  0x16   : > { %650 = vsyncadd (%p532_p9), [#allocation3], 4294966272  ;;  %p152_p13 = scmp.lt.s32.totalorder %s712_s13, 1  ;;  %v674_v0 = vmov 0   ;;  %v172_v2 = vld [vmem:[#allocation2 + $0x38] sm:$0xff]  ;;  %v171_v3 = vld [vmem:[#allocation2 + $0x30] sm:$0xff]  ;;  %v157_v50 = vlaneseq }
  0x17   : > { %572 = vset.pattern.permute.xlu0 %v674_v0  ;;  %v754_v4 = vand.u32 4294901760, %v172_v2  ;;  %v756_v5 = vand.u32 4294901760, %v171_v3  ;;  %v170_v6 = vld [vmem:[#allocation2 + $0x28] sm:$0xff]  ;;  %v169_v7 = vld [vmem:[#allocation2 + $0x20] sm:$0xff]  ;;  %v168_v8 = vld [vmem:[#allocation2 + $0x18] sm:$0xff]  ;;  %vm173_vm0 = vcmask 523264  }
  0x18   : > { %s153_s28 = scalar_select %p152_p13, %s712_s13, 1  ;;  %v758_v9 = vand.u32 4294901760, %v170_v6  ;;  %v760_v10 = vand.u32 4294901760, %v169_v7  ;;  %v762_v11 = vand.u32 4294901760, %v168_v8  ;;  %v167_v12 = vld [vmem:[#allocation2 + $0x10] sm:$0xff]  ;;  %v166_v13 = vld [vmem:[#allocation2 + $0x8] sm:$0xff] }
  0x19   : > { %v165_v14 = vld [vmem:[#allocation2] sm:$0xff]  ;;  %v765_v15 = vsub.f32 %v172_v2, %v754_v4  ;;  %v768_v16 = vsub.f32 %v171_v3, %v756_v5  ;;  %186 = vmatpush.msra.mxu0 %v754_v4  ;;  %v771_v17 = vand.u32 4294901760, %v167_v12  ;;  %v773_v18 = vand.u32 4294901760, %v166_v13  ;;  %318 = vmatpush.msra.mxu3 %v754_v4  ;;  %s149_s5 = sand.u32 1, %s661_s10   ;;  %s515_s7 = sshll.u32 %s712_s13, 3 }
  0x1a   : > { %s509_s29 = sshll.u32 %s153_s28, 3  ;;  %v231_v19 = vsub.f32 %v170_v6, %v758_v9  ;;  %v778_v20 = vsub.f32 %v169_v7, %v760_v10  ;;  %v781_v21 = vsub.f32 %v168_v8, %v762_v11  ;;  %v783_v22 = vand.u32 4294901760, %v165_v14  ;;  %s508_s6 = sshll.u32 %s149_s5, 3 }
  0x1b   : > { %s155_s4 = scalar_lea.vmem %s859_s0, %s509_s29  ;;  %v220_v23 = vand.u32 4294901760, %v765_v15  ;;  %v226_v24 = vand.u32 4294901760, %v768_v16  ;;  %v788_v25 = vsub.f32 %v167_v12, %v771_v17  ;;  %281 = vmatpush.msra.mxu2 %v765_v15  ;;  %188 = vmatpush.msra.mxu0 %v756_v5  ;;  %v255_v31 = vsub.f32 %v166_v13, %v773_v18  ;;  %s426_s16 = scalar_lea.hbm %s861_s2, %s515_s7 }
  0x1c   : > { %v156_v1 = vld [vmem:[%s155_s4] sm:$0xff]  ;;  %v232_v26 = vand.u32 4294901760, %v231_v19  ;;  %v238_v27 = vand.u32 4294901760, %v778_v20  ;;  %320 = vmatpush.msra.mxu3 %v756_v5  ;;  %v244_v30 = vand.u32 4294901760, %v781_v21  ;;  %v261_v33 = vsub.f32 %v165_v14, %v783_v22  ;;  %s151_s17 = scalar_lea.vmem [#allocation5], %s508_s6  ;;  %s430_s22 = sshll.u32 %s426_s16, 4  ;;  %s431_s22 = int_to_ptr.hbm [resolvable:$true] %s430_s22 }
  0x1d   : > { %160 = vperm.xlu0 %572, %v156_v1   ;;  %v221_v28 = vsub.f32 %v765_v15, %v220_v23  ;;  %v227_v29 = vsub.f32 %v768_v16, %v226_v24  ;;  %284 = vmatpush.msra.mxu2 %v768_v16  ;;  %v250_v37 = vand.u32 4294901760, %v788_v25  ;;  %v256_v40 = vand.u32 4294901760, %v255_v31  ;;  %s428_s21 = sshll.u32 %s151_s17, 4  ;;  %s416_s23 = scalar_lea.sflag [#allocation4], %s149_s5  ;;  %s429_s21 = int_to_ptr.vmem [resolvable:$true] %s428_s21 }
  0x1e   : > { %190 = vmatpush.msra.mxu0 %v758_v9  ;;  %v233_v32 = vsub.f32 %v231_v19, %v232_v26  ;;  %322 = vmatpush.msra.mxu3 %v758_v9  ;;  %v239_v36 = vsub.f32 %v778_v20, %v238_v27  ;;  %v245_v39 = vsub.f32 %v781_v21, %v244_v30  ;;  %v262_v43 = vand.u32 4294901760, %v261_v33  ;;  %s617_s13 = sshra.s32 %s431_s22, 4  ;;  %s623_s27 = scalar_lea.hbm %s861_s2, 16  ;;  %s618_s13 = int_to_ptr.hbm [resolvable:$true] %s617_s13 }
  0x1f   : > { %v222_v34 = vand.u32 4294901760, %v221_v28  ;;  %v228_v35 = vand.u32 4294901760, %v227_v29  ;;  %287 = vmatpush.msra.mxu2 %v231_v19  ;;  %v251_v42 = vsub.f32 %v788_v25, %v250_v37  ;;  %v257_v45 = vsub.f32 %v255_v31, %v256_v40  ;;  %s619_s24 = scalar_lea.hbm %s618_s13, 8  ;;  %p624_p3 = scmp.lt.s32.totalorder %s618_s13, %s861_s2 }
  0x20   : > { %192 = vmatpush.msra.mxu0 %v760_v10  ;;  %324 = vmatpush.msra.mxu3 %v760_v10  ;;  %v234_v38 = vand.u32 4294901760, %v233_v32  ;;  %v240_v41 = vand.u32 4294901760, %v239_v36  ;;  %v246_v44 = vand.u32 4294901760, %v245_v39  ;;  %v263_v47 = vsub.f32 %v261_v33, %v262_v43  ;;  %p620_p0 = scmp.ne.s32.totalorder %s618_s13, %s619_s24  ;;  %p625_p4 = scmp.lt.s32.totalorder %s623_s27, %s619_s24 }
  0x21   : > { %223 = vmatpush.msra.mxu1 %v222_v34  ;;  %290 = vmatpush.msra.mxu2 %v778_v20  ;;  %v252_v46 = vand.u32 4294901760, %v251_v42  ;;  %v258_v48 = vand.u32 4294901760, %v257_v45  ;;  %v158_v51 = vand.u32 127, %v157_v50  ;;  %v675_v53 = vmov 0.0  }
  0x22   : > { %194 = vmatpush.msra.mxu0 %v762_v11  ;;  %326 = vmatpush.msra.mxu3 %v762_v11  ;;  %v264_v49 = vand.u32 4294901760, %v263_v47  ;;  %p621_p1 = pnand %p620_p0, %p729_p5  ;;  %p626_p7 = por %p625_p4, %p624_p3 }
  0x23   : > { %229 = vmatpush.msra.mxu1 %v228_v35  ;;  %293 = vmatpush.msra.mxu2 %v781_v21 }
  0x24   : > { %196 = vmatpush.msra.mxu0 %v771_v17  ;;  %328 = vmatpush.msra.mxu3 %v771_v17  ;;  %p622_p2 = pneg %p621_p1 }
  0x25   : > { %235 = vmatpush.msra.mxu1 %v234_v38  ;;  %296 = vmatpush.msra.mxu2 %v788_v25 }
  0x26   : > { %198 = vmatpush.msra.mxu0 %v773_v18  ;;  %330 = vmatpush.msra.mxu3 %v773_v18  ;;  %p627_p8 = pnand %p626_p7, %p622_p2 }
  0x27   : > { %241 = vmatpush.msra.mxu1 %v240_v41  ;;  %299 = vmatpush.msra.mxu2 %v255_v31 }
  0x28   : > { %200 = vmatpush.msra.mxu0 %v783_v22  ;;  %332 = vmatpush.msra.mxu3 %v783_v22 }
  0x29   : > { %247 = vmatpush.msra.mxu1 %v246_v44  ;;  %302 = vmatpush.msra.mxu2 %v261_v33 }
  0x2a   : > { %351 = vmatpush.msrb.mxu0 %v220_v23 }
  0x2b   : > { %253 = vmatpush.msra.mxu1 %v252_v46 }
  0x2c   : > { %355 = vmatpush.msrb.mxu0 %v226_v24 }
  0x2d   : > { %259 = vmatpush.msra.mxu1 %v258_v48 }
  0x2e   : > { %359 = vmatpush.msrb.mxu0 %v232_v26 }
  0x2f   : > { %265 = vmatpush.msra.mxu1 %v264_v49 }
  0x30   : > { %363 = vmatpush.msrb.mxu0 %v238_v27 }
  0x31   : > { %394 = vmatpush.msrb.mxu1 %v754_v4 }
  0x32   : > { %367 = vmatpush.msrb.mxu0 %v244_v30 }
  0x33   : > { %396 = vmatpush.msrb.mxu1 %v756_v5 }
  0x34   : > { %371 = vmatpush.msrb.mxu0 %v250_v37 }
  0x35   : > { %398 = vmatpush.msrb.mxu1 %v758_v9 }
  0x36   : > { %375 = vmatpush.msrb.mxu0 %v256_v40 }
  0x37   : > { %400 = vmatpush.msrb.mxu1 %v760_v10 }
  0x38   : > { %379 = vmatpush.msrb.mxu0 %v262_v43 }
  0x39   : > { %402 = vmatpush.msrb.mxu1 %v762_v11 }
  0x3b   : > { %404 = vmatpush.msrb.mxu1 %v771_v17 }
  0x3d   : > { %406 = vmatpush.msrb.mxu1 %v773_v18 }
  0x3f   : > { %408 = vmatpush.msrb.mxu1 %v783_v22 }
  0x8f   : > { %v161_v52 = vpop.permute.xlu0 %160 }
  0x90   : > { %vm162_vm1 = vcmp.eq.s32.totalorder %v161_v52, %v158_v51 }
  0x91   : > { %v510_v54 = vsel %vm162_vm1, 1.0, %v675_v53 }
  0x92   : > { %511 = vmatmul.msk.f32.vlgmr.msra.gmra.mxu1 %vm173_vm0, %v510_v54  ;;  %v175_v55 = vsel %vm173_vm0, %v510_v54, 0 }
  0x93   : > { %v202_v56 = vsub.f32 %v175_v55, %v175_v55 }
  0x95   : > { %305 = vmatmul.f32.vlgmr.msra.gmra.mxu2 %v202_v56  ;;  %v203_v57 = vand.u32 4294901760, %v202_v56 }
  0x97   : > { %336 = vmatmul.f32.vlgmr.msra.gmra.mxu3 %v203_v57  ;;  %v204_v58 = vsub.f32 %v202_v56, %v203_v57 }
  0x99   : > { %v205_v59 = vand.u32 4294901760, %v204_v58 }
  0x9a   : > { %513 = vmatmul.msk.f32.vlgmr.msrb.gmra.mxu1 %vm173_vm0, %v510_v54 }
  0x9b   : > { %206 = vmatmul.f32.vlgmr.msra.gmra.mxu0 %v205_v59 }
  0xa3   : > { %512 = vmatmul.msk.f32.vlgmr.msrb.gmra.mxu0 %vm173_vm0, %v510_v54 }
 0x10f   : > { %v268_v60 = vpop.f32.mrf.mxu1 }
 0x117   : > { %v411_v5 = vpop.f32.mrf.mxu1 }
 0x118   : > { %v207_v61 = vpop.f32.mrf.mxu0  ;;  %v306_v63 = vpop.f32.mrf.mxu2 }
 0x119   : > { %v269_v62 = vadd.f32 %v268_v60, %v207_v61 }
 0x11a   : > { %v337_v1 = vpop.f32.mrf.mxu3 }
 0x11b   : > { %v307_v0 = vadd.f32 %v306_v63, %v269_v62 }
 0x11d   : > { %v338_v2 = vadd.f32 %v337_v1, %v307_v0 }
 0x120   : > { %v382_v3 = vpop.f32.mrf.mxu0 }
 0x121   : > { %v383_v4 = vadd.f32 %v382_v3, %v338_v2 }
 0x123   : > { %v412_v6 = vadd.f32 %v411_v5, %v383_v4 }
 0x125   : > { %414 = vst [vmem:[%s151_s17] sm:$0xff] %v412_v6 }
 0x126   : > { %630 = shalt.err (!%p627_p8)
}
 0x127   : > { %522 = dma.vmem_to_hbm [thread:$0]  (%p729_p5), %s429_s21, 128, %s431_s22, %s416_s23  }
 0x128 PF: > { %p534_p9 = scmp.ge.s32.totalorder %s669_s12, 2  ;;  %s442_s30 = sand.u32 1, %s657_s9  }
 0x129   : > { %s443_s3 = scalar_lea.sflag [#allocation4], %s442_s30 }
 0x12a   : > { %p529_p10 = pnand %p534_p9, %p733_p6 }
 0x12c   : > { %p530_p11 = pneg %p529_p10 }
 0x12e   : > { %652 = dma.done.wait (%p530_p11), %s443_s3, 128  }
 0x12f   : > { %654 = vsyncadd (%p530_p11), %s443_s3, 4294967168  ;;  %p13_p12 = scmp.ge.s32.totalorder %s716_s15, 4   ;;  %s864_s9 = smov %s661_s10 }
 0x130   : > { %s865_s10 = smov %s665_s11  ;;  %s866_s11 = smov %s727_s18 }
 0x131   : > { %s867_s12 = smov %s716_s15  ;;  %15 = sbr.rel (!%p13_p12) target bundleno = 4 (0x4), region = 68 }
 0x136   :  { %449 = vsyncpa [#allocation3], 1 }
 0x137   :  { %451 = vsyncpa [#allocation3 + $0x1], 1 }
 0x138   :  { %452 = vsyncpa [#allocation4], 1 }
 0x139   :  { %454 = vsyncpa [#allocation4 + $0x1], 1 }

</bundles_post_ra>
